<compile_context>
chip_gen: v7x
topology: tpu7x:2x2x1
jax: 0.10.0
libtpu: 0.0.40
codegen_flags: <defaults>
</compile_context>

<pallas_src>
import functools

import jax
import jax.numpy as jnp
from jax.experimental import pallas as pl
from jax.experimental.pallas import tpu as pltpu


def _focal_loss_kernel(x_ref, t_ref, out_ref, *, gamma, n_rows, block_rows):
    i = pl.program_id(0)

    x = x_ref[...].astype(jnp.float32)
    t = t_ref[...].astype(jnp.float32)

    # Stable building blocks: one exp + one log per element.
    #   softplus(x)  = max(x, 0) + log(1 + exp(-|x|)) = -log(1 - p)
    #   softplus(-x) = softplus(x) - x                = -log(p)
    #   sigmoid(x)   = (x >= 0 ? 1 : e) / (1 + e),  e = exp(-|x|)
    e = jnp.exp(-jnp.abs(x))
    log1pe = jnp.log(1.0 + e)
    sp_pos = jnp.maximum(x, 0.0) + log1pe          # -log(1 - p) >= 0
    sp_neg = sp_pos - x                            # -log(p)     >= 0
    inv_denom = 1.0 / (1.0 + e)
    p = jnp.where(x >= 0, inv_denom, e * inv_denom)
    one_m_p = 1.0 - p

    g = float(gamma)
    if g == int(g) and 0 <= int(g) <= 8:
        gi = int(g)
        if gi == 0:
            w_pos = jnp.ones_like(p)
            w_neg = jnp.ones_like(p)
        else:
            w_pos, w_neg = one_m_p, p
            for _ in range(gi - 1):                # VPU multiplies, no pow
                w_pos = w_pos * one_m_p
                w_neg = w_neg * p
    else:
        # (1-p)**g = exp(g*log(1-p)) = exp(-g*softplus(x)); p**g likewise.
        w_pos = jnp.exp(-g * sp_pos)
        w_neg = jnp.exp(-g * sp_neg)

    # loss = -(1-p)**g * t * log(p) - p**g * (1-t) * log(1-p)
    loss = w_pos * t * sp_neg + w_neg * (1.0 - t) * sp_pos

    # Mask padded tail rows (code only materialised when N % block_rows != 0).
    if n_rows % block_rows != 0:
        row = jax.lax.broadcasted_iota(jnp.int32, loss.shape, 0) + i * block_rows
        loss = jnp.where(row < n_rows, loss, 0.0)

    # Fold the tile into a lane-dense partial sum using pure VPU adds.
    br, c = loss.shape
    part = loss.reshape(br // 8, 8, c).sum(axis=0)            # (8, c)
    if c % 128 == 0 and c > 128:
        # Static 128-wide slice adds (clean lane-aligned slices, no relayout).
        acc = part[:, 0:128]
        for k in range(1, c // 128):
            acc = acc + part[:, k * 128:(k + 1) * 128]
        part = acc                                            # (8, 128)
    out_ref[...] = part[None]


def focal_loss(inputs, targets, gamma=2.0, block_rows=None,
               vmem_limit_bytes=32 * 1024 * 1024):
    """Pallas TPU implementation of FocalLoss.forward (mean reduction)."""
    assert inputs.shape == targets.shape and inputs.ndim == 2
    n, c = inputs.shape

    if block_rows is None:
        # Target ~2 MiB f32 per input tile (2 inputs x 2 buffers ~= 8 MiB VMEM).
        # TODO(synk): for very large class counts, also tile the class axis.
        target_bytes = 2 * 1024 * 1024
        block_rows = max(8, min(2048, (target_bytes // (c * 4)) // 8 * 8))
        block_rows = min(block_rows, ((n + 7) // 8) * 8)      # <= padded N
    assert block_rows % 8 == 0 and block_rows > 0

    num_blocks = pl.cdiv(n, block_rows)
    c_fold = 128 if c % 128 == 0 else c

    kernel = functools.partial(
        _focal_loss_kernel, gamma=float(gamma), n_rows=n, block_rows=block_rows
    )

    partials = pl.pallas_call(
        kernel,
        out_shape=jax.ShapeDtypeStruct((num_blocks, 8, c_fold), jnp.float32),
        grid_spec=pltpu.PrefetchScalarGridSpec(
            num_scalar_prefetch=0,
            grid=(num_blocks,),
            in_specs=[
                pl.BlockSpec((block_rows, c), lambda i: (i, 0)),
                pl.BlockSpec((block_rows, c), lambda i: (i, 0)),
            ],
            out_specs=pl.BlockSpec((1, 8, c_fold), lambda i: (i, 0, 0)),
        ),
        compiler_params=pltpu.CompilerParams(
            dimension_semantics=("parallel",),   # independent partial sums
            vmem_limit_bytes=vmem_limit_bytes,
        ),
    )(inputs, targets)

    # Tiny final reduction + mean in plain JAX.
    return jnp.sum(partials) / jnp.float32(n * c)


def focal_loss_ref(inputs, targets, gamma=2.0):
    """Plain-JAX reference mirroring the PyTorch module."""
    p = jax.nn.sigmoid(inputs)
    loss = (-(1 - p) ** gamma * targets * jnp.log(p)
            - p ** gamma * (1 - targets) * jnp.log(1 - p))
    return jnp.mean(loss)


if __name__ == "__main__":
    key = jax.random.PRNGKey(0)
    k1, k2, k3, k4, k5, k6 = jax.random.split(key, 6)

    # Case 1: divisible shapes, default row tile, integer gamma=2.
    N1, C1 = 32, 128
    logits1 = jax.random.normal(k1, (N1, C1), dtype=jnp.float32)
    labels1 = (jax.random.uniform(k2, (N1, C1)) > 0.5).astype(jnp.float32)
    out1 = jax.block_until_ready(focal_loss(logits1, labels1, gamma=2.0))
    ref1 = focal_loss_ref(logits1, labels1, gamma=2.0)
    assert jnp.allclose(out1, ref1, rtol=1e-5, atol=1e-6), (out1, ref1)

    # Case 2: ragged batch + non-128 class count + non-integer gamma
    # (exercises the tail mask and the exp(-g*softplus) path).
    N2, C2 = 20, 96
    logits2 = jax.random.normal(k3, (N2, C2), dtype=jnp.float32)
    labels2 = (jax.random.uniform(k4, (N2, C2)) > 0.5).astype(jnp.float32)
    out2 = jax.block_until_ready(
        focal_loss(logits2, labels2, gamma=1.5, block_rows=16))
    ref2 = focal_loss_ref(logits2, labels2, gamma=1.5)
    assert jnp.allclose(out2, ref2, rtol=2e-5, atol=1e-6), (out2, ref2)

    # Case 3: C > 128 multiple of 128 (exercises the lane-fold path), gamma=3.
    N3, C3 = 16, 256
    logits3 = jax.random.normal(k5, (N3, C3), dtype=jnp.float32)
    labels3 = (jax.random.uniform(k6, (N3, C3)) > 0.5).astype(jnp.float32)
    out3 = jax.block_until_ready(focal_loss(logits3, labels3, gamma=3.0))
    ref3 = focal_loss_ref(logits3, labels3, gamma=3.0)
    assert jnp.allclose(out3, ref3, rtol=1e-5, atol=1e-6), (out3, ref3)

    print("KERNEL_OK")
</pallas_src>

<mosaic_0001>
module attributes {stable_mosaic.version = 11 : i64} {
  func.func @_focal_loss_kernel(%arg0: i32, %arg1: memref<32x128xf32, #tpu.memory_space<vmem>>, %arg2: memref<32x128xf32, #tpu.memory_space<vmem>>, %arg3: memref<1x8x128xf32, #tpu.memory_space<vmem>>) attributes {dimension_semantics = [#tpu.dimension_semantics<parallel>], iteration_bounds = array<i64: 1>, scalar_prefetch = 0 : i64, scratch_operands = 0 : i64, tpu.core_type = #tpu.core_type<tc>, window_params = [{transform_indices = @transform_0, window_bounds = array<i64: 32, 128>}, {transform_indices = @transform_1, window_bounds = array<i64: 32, 128>}, {transform_indices = @transform_2, window_bounds = array<i64: 1, 8, 128>}]} {
    %c0 = arith.constant 0 : index
    %c0_0 = arith.constant 0 : index
    %0 = vector.load %arg1[%c0, %c0_0] : memref<32x128xf32, #tpu.memory_space<vmem>>, vector<32x128xf32>
    %c0_1 = arith.constant 0 : index
    %c0_2 = arith.constant 0 : index
    %1 = vector.load %arg2[%c0_1, %c0_2] : memref<32x128xf32, #tpu.memory_space<vmem>>, vector<32x128xf32>
    %2 = math.absf %0 : vector<32x128xf32>
    %cst = arith.constant 0.000000e+00 : f32
    %3 = vector.broadcast %cst : f32 to vector<32x128xf32>
    %4 = arith.subf %3, %2 : vector<32x128xf32>
    %5 = math.exp %4 : vector<32x128xf32>
    %cst_3 = arith.constant 1.000000e+00 : f32
    %6 = vector.broadcast %cst_3 : f32 to vector<32x128xf32>
    %7 = arith.addf %6, %5 : vector<32x128xf32>
    %8 = math.log %7 : vector<32x128xf32>
    %cst_4 = arith.constant 0.000000e+00 : f32
    %9 = vector.broadcast %cst_4 : f32 to vector<32x128xf32>
    %10 = arith.maximumf %0, %9 : vector<32x128xf32>
    %11 = arith.addf %10, %8 : vector<32x128xf32>
    %12 = arith.subf %11, %0 : vector<32x128xf32>
    %cst_5 = arith.constant 1.000000e+00 : f32
    %13 = vector.broadcast %cst_5 : f32 to vector<32x128xf32>
    %14 = arith.addf %13, %5 : vector<32x128xf32>
    %cst_6 = arith.constant 1.000000e+00 : f32
    %15 = vector.broadcast %cst_6 : f32 to vector<32x128xf32>
    %16 = arith.divf %15, %14 : vector<32x128xf32>
    %cst_7 = arith.constant 0.000000e+00 : f32
    %17 = vector.broadcast %cst_7 : f32 to vector<32x128xf32>
    %18 = arith.cmpf oge, %0, %17 : vector<32x128xf32>
    %19 = arith.mulf %5, %16 : vector<32x128xf32>
    %20 = arith.select %18, %16, %19 : vector<32x128xi1>, vector<32x128xf32>
    %cst_8 = arith.constant 1.000000e+00 : f32
    %21 = vector.broadcast %cst_8 : f32 to vector<32x128xf32>
    %22 = arith.subf %21, %20 : vector<32x128xf32>
    %23 = arith.mulf %22, %22 : vector<32x128xf32>
    %24 = arith.mulf %20, %20 : vector<32x128xf32>
    %25 = arith.mulf %23, %1 : vector<32x128xf32>
    %26 = arith.mulf %25, %12 : vector<32x128xf32>
    %cst_9 = arith.constant 1.000000e+00 : f32
    %27 = vector.broadcast %cst_9 : f32 to vector<32x128xf32>
    %28 = arith.subf %27, %1 : vector<32x128xf32>
    %29 = arith.mulf %24, %28 : vector<32x128xf32>
    %30 = arith.mulf %29, %11 : vector<32x128xf32>
    %31 = arith.addf %26, %30 : vector<32x128xf32>
    %32 = vector.shape_cast %31 : vector<32x128xf32> to vector<4x8x128xf32>
    %cst_10 = arith.constant dense<0.000000e+00> : vector<8x128xf32>
    %33 = vector.multi_reduction <add>, %32, %cst_10 [0] : vector<4x8x128xf32> to vector<8x128xf32>
    %34 = vector.shape_cast %33 : vector<8x128xf32> to vector<1x8x128xf32>
    %c0_11 = arith.constant 0 : index
    %c0_12 = arith.constant 0 : index
    %c0_13 = arith.constant 0 : index
    %35 = vector.load %arg3[%c0_11, %c0_12, %c0_13] : memref<1x8x128xf32, #tpu.memory_space<vmem>>, vector<1x8x128xf32>
    tpu.vector_store %arg3[%c0_11, %c0_12, %c0_13], %34 {strides = array<i32>} : memref<1x8x128xf32, #tpu.memory_space<vmem>>, vector<1x8x128xf32>,
    return
  }
  func.func @transform_0(%arg0: i32) -> (i32, i32) {
    %c0_i32 = arith.constant 0 : i32
    %c0_i32_0 = arith.constant 0 : i32
    return %arg0, %c0_i32 : i32, i32
  }
  func.func @transform_1(%arg0: i32) -> (i32, i32) {
    %c0_i32 = arith.constant 0 : i32
    %c0_i32_0 = arith.constant 0 : i32
    return %arg0, %c0_i32 : i32, i32
  }
  func.func @transform_2(%arg0: i32) -> (i32, i32, i32) {
    %c0_i32 = arith.constant 0 : i32
    %c0_i32_0 = arith.constant 0 : i32
    %c0_i32_1 = arith.constant 0 : i32
    return %arg0, %c0_i32, %c0_i32_0 : i32, i32, i32
  }
}

</mosaic_0001>

<bundles_post_ra>
// kernel: tpu_custom_call.1
= control target key start
LH: loop header
LB: loop body
LE: loop exit
PB: predicated region body
PF: predicated region fallthrough
CT: control target
= control target key end

     0   :  { %7 = vsyncpa [#allocation3], 0  ;;  %s353_s0 = inlined_call_operand.hbm [shape: f32[32,128], index: 0, kind: input, shape index: {}]   ;;  %s354_s1 = inlined_call_operand.hbm [shape: f32[32,128], index: 1, kind: input, shape index: {}]   ;;  %s355_s2 = inlined_call_operand.hbm [shape: f32[1,8,128], index: 2, kind: output, shape index: {}]  }
   0x1   :  { %8 = vsyncpa [#allocation6], 0 }
   0x2   :  { %9 = vsyncpa [#allocation4], 0  ;;  %s265_s9 = smov [#allocation2]   ;;  %s193_s13 = scalar_lea.hbm %s353_s0, 512 }
   0x3   :  { %s15_s10 = sshll.u32 %s265_s9, 4  ;;  %p194_p0 = scmp.ne.s32.totalorder %s353_s0, %s193_s13  ;;  %s16_s10 = int_to_ptr.vmem [resolvable:$true] %s15_s10 }
   0x4   :  { %p197_p1 = scmp.lt.u32.totalorder %s193_s13, %s353_s0 }
   0x6   :  { %p199_p2 = pnand %p197_p1, %p194_p0 }
   0x8   :  { %202 = shalt.err (!%p199_p2)
}
   0x9   :  { %s203_s18 = scalar_lea.vmem %s16_s10, 512  ;;  %p208_p4 = scmp.lt.s32.totalorder %s16_s10, %s16_s10 }
   0xa   :  { %p204_p3 = scmp.ne.s32.totalorder %s16_s10, %s203_s18  ;;  %p209_p5 = scmp.lt.s32.totalorder %s203_s18, %s203_s18 }
   0xc   :  { %p210_p6 = por %p209_p5, %p208_p4 }
   0xe   :  { %p211_p7 = pnand %p210_p6, %p204_p3 }
  0x10   :  { %214 = shalt.err (!%p211_p7)
}
  0x11   :  { %s266_s19 = smov 128   ;;  %s267_s20 = smov 8  }
  0x12   :  { %21 = dma.hbm_to_vmem [thread:$0]  %s353_s0, 512, %s16_s10, [#allocation3], %s266_s19, %s266_s19, %s267_s20  }
  0x13   :  { %s268_s23 = smov [#allocation5]   ;;  %s215_s27 = scalar_lea.hbm %s354_s1, 512 }
  0x14   :  { %s27_s24 = sshll.u32 %s268_s23, 4  ;;  %p216_p8 = scmp.ne.s32.totalorder %s354_s1, %s215_s27  ;;  %s28_s24 = int_to_ptr.vmem [resolvable:$true] %s27_s24 }
  0x15   :  { %p219_p9 = scmp.lt.u32.totalorder %s215_s27, %s354_s1 }
  0x17   :  { %p221_p10 = pnand %p219_p9, %p216_p8 }
  0x19   :  { %224 = shalt.err (!%p221_p10)
}
  0x1a   :  { %s225_s4 = scalar_lea.vmem %s28_s24, 512  ;;  %p230_p12 = scmp.lt.s32.totalorder %s28_s24, %s28_s24 }
  0x1b   :  { %p226_p11 = scmp.ne.s32.totalorder %s28_s24, %s225_s4  ;;  %p231_p13 = scmp.lt.s32.totalorder %s225_s4, %s225_s4 }
  0x1d   :  { %p232_p0 = por %p231_p13, %p230_p12 }
  0x1f   :  { %p233_p1 = pnand %p232_p0, %p226_p11 }
  0x21   :  { %236 = shalt.err (!%p233_p1)
}
  0x22   :  { %33 = dma.hbm_to_vmem [thread:$0]  %s354_s1, 512, %s28_s24, [#allocation6], %s266_s19, %s266_s19, %s267_s20  }
  0x23   :  { %259 = dma.done.wait [#allocation3], 512  }
  0x24   :  { %260 = vsyncadd [#allocation3], 4294966784 }
  0x25   :  { %261 = dma.done.wait [#allocation6], 512  }
  0x26   :  { %262 = vsyncadd [#allocation6], 4294966784  ;;  %v309_v0 = vld [vmem:[#allocation2] sm:$0xff]  ;;  %v311_v1 = vld [vmem:[#allocation2 + $0x8] sm:$0xff]  ;;  %s269_s1 = smov [#allocation7]  }
  0x27   :  { %v313_v2 = vld [vmem:[#allocation2 + $0x10] sm:$0xff]  ;;  %v315_v3 = vld [vmem:[#allocation2 + $0x18] sm:$0xff]  ;;  %v48_v4 = vand.u32 2147483647, %v309_v0  ;;  %v49_v5 = vand.u32 2147483647, %v311_v1 }
  0x28   :  { %v50_v6 = vand.u32 2147483647, %v313_v2  ;;  %v51_v7 = vand.u32 2147483647, %v315_v3  ;;  %v76_v24 = vmax.f32 %v309_v0, 0.0  ;;  %v77_v26 = vmax.f32 %v311_v1, 0.0 }
  0x29   :  { %v52_v8 = vsub.f32 0.0, %v48_v4  ;;  %v53_v9 = vsub.f32 0.0, %v49_v5  ;;  %v44_v28 = vld [vmem:[#allocation5] sm:$0xff]  ;;  %v78_v30 = vmax.f32 %v313_v2, 0.0  ;;  %v45_v32 = vld [vmem:[#allocation5 + $0x8] sm:$0xff]  ;;  %v46_v33 = vld [vmem:[#allocation5 + $0x10] sm:$0xff] }
  0x2a   :  { %v54_v10 = vsub.f32 0.0, %v50_v6  ;;  %v55_v11 = vsub.f32 0.0, %v51_v7  ;;  %v79_v35 = vmax.f32 %v315_v3, 0.0  ;;  %vm96_vm0 = vcmp.ge.f32.partialorder %v309_v0, 0.0  ;;  %v47_v37 = vld [vmem:[#allocation5 + $0x18] sm:$0xff]  ;;  %s154_s6 = sshll.u32 %s269_s1, 4  ;;  %s155_s6 = int_to_ptr.vmem [resolvable:$true] %s154_s6 }
  0x2b   :  { %v56_v12 = vmul.f32 1.442695, %v52_v8  ;;  %v58_v13 = vmul.f32 1.442695, %v53_v9  ;;  %vm97_vm1 = vcmp.ge.f32.partialorder %v311_v1, 0.0  ;;  %vm98_vm2 = vcmp.ge.f32.partialorder %v313_v2, 0.0  ;;  %p242_p3 = scmp.lt.s32.totalorder %s155_s6, %s155_s6 }
  0x2c   :  { %v60_v14 = vmul.f32 1.442695, %v54_v10  ;;  %v62_v15 = vmul.f32 1.442695, %v55_v11  ;;  %vm99_vm3 = vcmp.ge.f32.partialorder %v315_v3, 0.0  ;;  %v128_v43 = vsub.f32 1.0, %v44_v28 }
  0x2d   :  { %169 = vpow2.f32 %v56_v12  ;;  %v129_v47 = vsub.f32 1.0, %v45_v32  ;;  %v130_v48 = vsub.f32 1.0, %v46_v33  ;;  %v131_v53 = vsub.f32 1.0, %v47_v37  ;;  %s237_s7 = scalar_lea.vmem %s155_s6, 128 }
  0x2e   :  { %171 = vpow2.f32 %v58_v13  ;;  %p238_p2 = scmp.ne.s32.totalorder %s155_s6, %s237_s7  ;;  %p243_p4 = scmp.lt.s32.totalorder %s237_s7, %s237_s7 }
  0x2f   :  { %173 = vpow2.f32 %v60_v14 }
  0x30   :  { %175 = vpow2.f32 %v62_v15  ;;  %p244_p5 = por %p243_p4, %p242_p3 }
  0x32   :  { %p245_p6 = pnand %p244_p5, %p238_p2 }
  0x37   :  { %v170_v16 = vpop.eup %169 }
  0x38   :  { %v172_v17 = vpop.eup %171  ;;  %v64_v18 = vadd.f32 1.0, %v170_v16 }
  0x39   :  { %v174_v19 = vpop.eup %173  ;;  %v65_v20 = vadd.f32 1.0, %v172_v17 }
  0x3a   :  { %v176_v21 = vpop.eup %175  ;;  %v66_v22 = vadd.f32 1.0, %v174_v19  ;;  %177 = vlog2.f32 %v64_v18 }
  0x3b   :  { %v67_v23 = vadd.f32 1.0, %v176_v21  ;;  %179 = vlog2.f32 %v65_v20 }
  0x3c   :  { %181 = vlog2.f32 %v66_v22 }
  0x3d   :  { %183 = vlog2.f32 %v67_v23 }
  0x3e   :  { %185 = vrcp.f32 %v64_v18 }
  0x3f   :  { %187 = vrcp.f32 %v65_v20 }
  0x40   :  { %189 = vrcp.f32 %v66_v22 }
  0x41   :  { %191 = vrcp.f32 %v67_v23 }
  0x44   :  { %v178_v25 = vpop.eup %177 }
  0x45   :  { %v180_v27 = vpop.eup %179  ;;  %v69_v29 = vmul.f32 0.6931472, %v178_v25 }
  0x46   :  { %v182_v31 = vpop.eup %181  ;;  %v71_v34 = vmul.f32 0.6931472, %v180_v27 }
  0x47   :  { %v184_v36 = vpop.eup %183  ;;  %v73_v38 = vmul.f32 0.6931472, %v182_v31  ;;  %v80_v39 = vadd.f32 %v76_v24, %v69_v29 }
  0x48   :  { %v186_v40 = vpop.eup %185  ;;  %v75_v41 = vmul.f32 0.6931472, %v184_v36  ;;  %v81_v42 = vadd.f32 %v77_v26, %v71_v34 }
  0x49   :  { %v188_v44 = vpop.eup %187  ;;  %v82_v45 = vadd.f32 %v78_v30, %v73_v38  ;;  %v100_v46 = vmul.f32 %v186_v40, %v170_v16  ;;  %v84_v51 = vsub.f32 %v80_v39, %v309_v0 }
  0x4a   :  { %v190_v49 = vpop.eup %189  ;;  %v83_v50 = vadd.f32 %v79_v35, %v75_v41  ;;  %v101_v52 = vmul.f32 %v188_v44, %v172_v17  ;;  %v85_v55 = vsub.f32 %v81_v42, %v311_v1 }
  0x4b   :  { %v192_v54 = vpop.eup %191  ;;  %v86_v56 = vsub.f32 %v82_v45, %v313_v2  ;;  %v102_v57 = vmul.f32 %v190_v49, %v174_v19  ;;  %v104_v58 = vsel %vm96_vm0, %v186_v40, %v100_v46 }
  0x4c   :  { %v87_v59 = vsub.f32 %v83_v50, %v315_v3  ;;  %v103_v60 = vmul.f32 %v192_v54, %v176_v21  ;;  %v105_v61 = vsel %vm97_vm1, %v188_v44, %v101_v52  ;;  %v108_v62 = vsub.f32 1.0, %v104_v58 }
  0x4d   :  { %v106_v63 = vsel %vm98_vm2, %v190_v49, %v102_v57  ;;  %v109_v4 = vsub.f32 1.0, %v105_v61  ;;  %v116_v5 = vmul.f32 %v104_v58, %v104_v58  ;;  %v117_v6 = vmul.f32 %v105_v61, %v105_v61 }
  0x4e   :  { %v107_v7 = vsel %vm99_vm3, %v192_v54, %v103_v60  ;;  %v110_v8 = vsub.f32 1.0, %v106_v63  ;;  %v112_v9 = vmul.f32 %v108_v62, %v108_v62  ;;  %v118_v0 = vmul.f32 %v106_v63, %v106_v63 }
  0x4f   :  { %v111_v10 = vsub.f32 1.0, %v107_v7  ;;  %v113_v11 = vmul.f32 %v109_v4, %v109_v4  ;;  %v119_v12 = vmul.f32 %v107_v7, %v107_v7  ;;  %v132_v13 = vmul.f32 %v128_v43, %v116_v5 }
  0x50   :  { %v114_v14 = vmul.f32 %v110_v8, %v110_v8  ;;  %v120_v1 = vmul.f32 %v112_v9, %v44_v28  ;;  %v133_v15 = vmul.f32 %v129_v47, %v117_v6  ;;  %v134_v16 = vmul.f32 %v130_v48, %v118_v0 }
  0x51   :  { %v115_v17 = vmul.f32 %v111_v10, %v111_v10  ;;  %v121_v2 = vmul.f32 %v113_v11, %v45_v32  ;;  %v135_v18 = vmul.f32 %v131_v53, %v119_v12  ;;  %v136_v19 = vmul.f32 %v132_v13, %v80_v39 }
  0x52   :  { %v122_v20 = vmul.f32 %v114_v14, %v46_v33  ;;  %v124_v21 = vmul.f32 %v120_v1, %v84_v51  ;;  %v137_v22 = vmul.f32 %v133_v15, %v81_v42  ;;  %v138_v3 = vmul.f32 %v134_v16, %v82_v45 }
  0x53   :  { %v123_v23 = vmul.f32 %v115_v17, %v47_v37  ;;  %v125_v24 = vmul.f32 %v121_v2, %v85_v55  ;;  %v139_v25 = vmul.f32 %v135_v18, %v83_v50 }
  0x54   :  { %v126_v26 = vmul.f32 %v122_v20, %v86_v56  ;;  %v140_v27 = vadd.f32 %v136_v19, %v124_v21 }
  0x55   :  { %v127_v29 = vmul.f32 %v123_v23, %v87_v59  ;;  %v141_v30 = vadd.f32 %v137_v22, %v125_v24 }
  0x56   :  { %v142_v31 = vadd.f32 %v138_v3, %v126_v26 }
  0x57   :  { %v143_v34 = vadd.f32 %v139_v25, %v127_v29  ;;  %v144_v28 = vadd.f32 %v141_v30, %v140_v27 }
  0x59   :  { %v145_v35 = vadd.f32 %v144_v28, %v142_v31 }
  0x5b   :  { %v146_v32 = vadd.f32 %v145_v35, %v143_v34 }
  0x5d   :  { %147 = vst [vmem:[#allocation7] sm:$0xff] %v146_v32 }
  0x5e   :  { %248 = shalt.err (!%p245_p6)
}
  0x5f   :  { %s249_s10 = scalar_lea.hbm %s355_s2, 128 }
  0x60   :  { %p250_p7 = scmp.ne.s32.totalorder %s355_s2, %s249_s10  ;;  %p253_p8 = scmp.lt.u32.totalorder %s249_s10, %s355_s2 }
  0x62   :  { %p255_p9 = pnand %p253_p8, %p250_p7 }
  0x64   :  { %258 = shalt.err (!%p255_p9)
}
  0x65   :  { %157 = dma.vmem_to_hbm [thread:$0]  %s155_s6, 128, %s355_s2, [#allocation4]  }
  0x66   :  { %263 = dma.done.wait [#allocation4], 128  }
  0x67   :  { %264 = vsyncadd [#allocation4], 4294967168 }
  0x68   :  { %161 = vsyncpa [#allocation3], 1 }
  0x69   :  { %162 = vsyncpa [#allocation6], 1 }
  0x6a   :  { %163 = vsyncpa [#allocation4], 1 }

</bundles_post_ra>
